<compile_context>
chip_gen: v7x
topology: tpu7x:2x2x1
jax: 0.10.0
libtpu: 0.0.40
codegen_flags: <defaults>
</compile_context>

<pallas_src>
import functools

import jax
import jax.numpy as jnp
from jax import lax
from jax.experimental import pallas as pl
from jax.experimental.pallas import tpu as pltpu


def _round_up(x, m):
    return (x + m - 1) // m * m


def _cdiv(a, b):
    return (a + b - 1) // b


def _tpu_generation():
    """Best-effort (vmem_bytes_per_tensorcore, tensorcores_per_device, is_v7x)."""
    kind = ""
    try:
        kind = jax.devices()[0].device_kind.lower()
    except Exception:
        pass
    is_v7 = "v7" in kind
    vmem = None
    try:
        vmem = int(pltpu.get_tpu_info().vmem_capacity_bytes)
    except Exception:
        vmem = None
    if not vmem or vmem <= 0:
        vmem = 64 * 1024 * 1024 if is_v7 else 128 * 1024 * 1024
    return vmem, (2 if is_v7 else 1), is_v7


def mlp_kernel(x_ref, w1_ref, b1_ref, w2_ref, b2_ref, w3_ref, b3_ref, o_ref,
               *, sub_m, unroll):
    """Fused 3-layer MLP on one (block_b, D) batch tile.

    bf16 MXU operands, f32 accumulation, f32 bias+ReLU epilogue.
    """
    # Weights / biases are VMEM-resident for the whole kernel; read them once.
    w1 = w1_ref[...]
    w2 = w2_ref[...]
    w3 = w3_ref[...]
    # Hoist bias broadcasts out of the sub-tile loop (JAX doesn't CSE
    # broadcast_in_dim; an unrolled loop would emit one per iteration).
    b1 = jnp.broadcast_to(b1_ref[...], (sub_m, w1.shape[1]))
    b2 = jnp.broadcast_to(b2_ref[...], (sub_m, w2.shape[1]))
    b3 = jnp.broadcast_to(b3_ref[...], (sub_m, w3.shape[1]))

    n_sub = x_ref.shape[0] // sub_m

    def body(s, carry):
        r = pl.multiple_of(s * sub_m, sub_m)
        x = x_ref[pl.ds(r, sub_m), :]                       # bf16
        h1 = jnp.maximum(
            jnp.dot(x, w1, preferred_element_type=jnp.float32) + b1, 0.0)
        h2 = jnp.maximum(
            jnp.dot(h1.astype(w2.dtype), w2,
                    preferred_element_type=jnp.float32) + b2, 0.0)
        h3 = jnp.dot(h2.astype(w3.dtype), w3,
                     preferred_element_type=jnp.float32) + b3
        o_ref[pl.ds(r, sub_m), :] = h3.astype(o_ref.dtype)
        return carry

    lax.fori_loop(0, n_sub, body, 0, unroll=unroll)


@functools.partial(jax.jit, static_argnames=("block_b",))
def mlp_forward(x, params, block_b=None):
    """x: [B, D] float32. params: dict of w1,b1,w2,b2,w3,b3 (f32)."""
    B, D = x.shape
    H1 = params["w1"].shape[1]   # 64
    H2 = params["w2"].shape[1]   # 32
    O = params["w3"].shape[1]    # output_dim

    vmem_bytes, num_cores, is_v7 = _tpu_generation()
    vmem_limit = int(vmem_bytes * 3 // 4)        # leave compiler-scratch headroom

    # HBM-bound: size the batch tile by bytes moved per grid step so the
    # ~0.35 us/step pipeline overhead stays <10%, bounded by the
    # double-buffered VMEM stream budget for this generation.
    in_row_bytes = 2 * D          # bf16 x stream
    out_row_bytes = 4 * O         # f32 output stream (unpadded)
    bytes_per_row = in_row_bytes + out_row_bytes

    if block_b is None:
        target_step_bytes = 8 * 1024 * 1024
        stream_budget = max(4 * 1024 * 1024, vmem_limit - 16 * 1024 * 1024)
        cap_vmem = stream_budget // (2 * bytes_per_row)     # 2x = double buffer
        block_b = max(8, min(target_step_bytes // bytes_per_row, cap_vmem))
        block_b = min(block_b, _round_up(B, 8))
        if block_b > 256:
            block_b = max(256, (block_b // 256) * 256)      # multiple of sub_m
            if num_cores >= 2 and B > 2 * 256:
                # v7x only: guarantee >=2 grid steps so both TCs get work.
                block_b = min(block_b,
                              max(256, _round_up(_cdiv(B, num_cores), 256)))
        block_b = _round_up(block_b, 8)

    # Inner sub-tile bounds vreg live ranges for large batch tiles.
    if block_b <= 256:
        sub_m = block_b
    elif block_b % 256 == 0:
        sub_m = 256
    else:
        sub_m = block_b              # irregular user tile: no inner sub-tiling
    n_sub = block_b // sub_m
    if n_sub <= 4:
        unroll = n_sub
    elif n_sub % 4 == 0:
        unroll = 4
    elif n_sub % 2 == 0:
        unroll = 2
    else:
        unroll = 1

    # bf16 operand streams (halves dominant HBM read, native MXU path);
    # biases stay f32 for the f32 epilogue.
    xb = x.astype(jnp.bfloat16)
    w1 = params["w1"].astype(jnp.bfloat16)
    w2 = params["w2"].astype(jnp.bfloat16)
    w3 = params["w3"].astype(jnp.bfloat16)
    b1 = params["b1"].astype(jnp.float32)
    b2 = params["b2"].astype(jnp.float32)
    b3 = params["b3"].astype(jnp.float32)

    grid = (pl.cdiv(B, block_b),)

    def const_spec(shape):
        # Grid-invariant weights/biases: single buffer (no pointless double).
        return pl.BlockSpec(shape, lambda i: (0, 0),
                            pipeline_mode=pl.Buffered(buffer_count=1))

    if is_v7 and grid[0] > 1:
        dim_sem = (pltpu.CORE_PARALLEL,)   # shard batch tiles across the 2 TCs
    else:
        dim_sem = ("parallel",)

    flops = 2 * B * (D * H1 + H1 * H2 + H2 * O)
    bytes_accessed = (2 * B * D + 4 * B * O
                      + 2 * (D * H1 + H1 * H2 + H2 * O)
                      + 4 * (H1 + H2 + O))

    out = pl.pallas_call(
        functools.partial(mlp_kernel, sub_m=sub_m, unroll=unroll),
        out_shape=jax.ShapeDtypeStruct((B, O), jnp.float32),
        grid_spec=pltpu.PrefetchScalarGridSpec(
            num_scalar_prefetch=0,
            grid=grid,
            in_specs=[
                pl.BlockSpec((block_b, D), lambda i: (i, 0)),   # x batch tile
                const_spec((D, H1)), const_spec((1, H1)),       # layer 1
                const_spec((H1, H2)), const_spec((1, H2)),      # layer 2
                const_spec((H2, O)), const_spec((1, O)),        # layer 3
            ],
            out_specs=pl.BlockSpec((block_b, O), lambda i: (i, 0)),
        ),
        compiler_params=pltpu.CompilerParams(
            dimension_semantics=dim_sem,
            vmem_limit_bytes=vmem_limit,
        ),
        cost_estimate=pl.CostEstimate(
            flops=flops, transcendentals=0, bytes_accessed=bytes_accessed),
    )(xb, w1, b1, w2, b2, w3, b3)

    return out


def init_params(key, input_dim, output_dim=16):
    """Deterministic init mimicking PyTorch Linear (uniform(-1/sqrt(in), 1/sqrt(in)))."""
    dims = [(input_dim, 64), (64, 32), (32, output_dim)]
    params = {}
    for idx, (fan_in, fan_out) in enumerate(dims, start=1):
        key, kw, kb = jax.random.split(key, 3)
        bound = 1.0 / jnp.sqrt(jnp.float32(fan_in))
        params[f"w{idx}"] = jax.random.uniform(
            kw, (fan_in, fan_out), jnp.float32, -bound, bound)
        params[f"b{idx}"] = jax.random.uniform(
            kb, (1, fan_out), jnp.float32, -bound, bound)
    return params


def mlp_reference(x, params):
    h = jnp.maximum(x @ params["w1"] + params["b1"], 0.0)
    h = jnp.maximum(h @ params["w2"] + params["b2"], 0.0)
    return h @ params["w3"] + params["b3"]


if __name__ == "__main__":
    key = jax.random.PRNGKey(0)
    k_x, k_p, k_x2, k_x3 = jax.random.split(key, 4)

    B, D, O = 8, 32, 16
    x = jax.random.normal(k_x, (B, D), jnp.float32)
    params = init_params(k_p, input_dim=D, output_dim=O)

    # bf16 operand streams -> loosened tolerance vs the f32 reference.
    TOL = dict(atol=5e-2, rtol=5e-2)

    out = jax.block_until_ready(mlp_forward(x, params))
    ref = mlp_reference(x, params)
    assert out.shape == (B, O), out.shape
    assert jnp.allclose(out, ref, **TOL), float(jnp.max(jnp.abs(out - ref)))

    # Multi-step grid with a ragged final batch tile.
    x2 = jax.random.normal(k_x2, (20, D), jnp.float32)
    out2 = jax.block_until_ready(mlp_forward(x2, params, block_b=8))
    ref2 = mlp_reference(x2, params)
    assert out2.shape == (20, O), out2.shape
    assert jnp.allclose(out2, ref2, **TOL), float(jnp.max(jnp.abs(out2 - ref2)))

    # Larger batch exercising auto tile sizing + the inner sub-tile loop
    # (block_b -> 1024, sub_m=256, partial unroll, ragged last tile).
    x3 = jax.random.normal(k_x3, (1040, D), jnp.float32)
    out3 = jax.block_until_ready(mlp_forward(x3, params))
    ref3 = mlp_reference(x3, params)
    assert out3.shape == (1040, O), out3.shape
    assert jnp.allclose(out3, ref3, **TOL), float(jnp.max(jnp.abs(out3 - ref3)))

    print("KERNEL_OK")
</pallas_src>

<mosaic_0001>
module attributes {stable_mosaic.version = 11 : i64} {
  func.func @mlp_kernel(%arg0: i32, %arg1: memref<8x32xbf16, #tpu.memory_space<vmem>>, %arg2: memref<32x64xbf16, #tpu.memory_space<vmem>>, %arg3: memref<1x64xf32, #tpu.memory_space<vmem>>, %arg4: memref<64x32xbf16, #tpu.memory_space<vmem>>, %arg5: memref<1x32xf32, #tpu.memory_space<vmem>>, %arg6: memref<32x16xbf16, #tpu.memory_space<vmem>>, %arg7: memref<1x16xf32, #tpu.memory_space<vmem>>, %arg8: memref<8x16xf32, #tpu.memory_space<vmem>>) attributes {dimension_semantics = [#tpu.dimension_semantics<parallel>], iteration_bounds = array<i64: 1>, scalar_prefetch = 0 : i64, scratch_operands = 0 : i64, tpu.core_type = #tpu.core_type<tc>, window_params = [{transform_indices = @transform_0, window_bounds = array<i64: 8, 32>}, {pipeline_mode = #tpu.pipeline_mode<synchronous>, transform_indices = @transform_1, window_bounds = array<i64: 32, 64>}, {pipeline_mode = #tpu.pipeline_mode<synchronous>, transform_indices = @transform_2, window_bounds = array<i64: 1, 64>}, {pipeline_mode = #tpu.pipeline_mode<synchronous>, transform_indices = @transform_3, window_bounds = array<i64: 64, 32>}, {pipeline_mode = #tpu.pipeline_mode<synchronous>, transform_indices = @transform_4, window_bounds = array<i64: 1, 32>}, {pipeline_mode = #tpu.pipeline_mode<synchronous>, transform_indices = @transform_5, window_bounds = array<i64: 32, 16>}, {pipeline_mode = #tpu.pipeline_mode<synchronous>, transform_indices = @transform_6, window_bounds = array<i64: 1, 16>}, {transform_indices = @transform_7, window_bounds = array<i64: 8, 16>}]} {
    %c0 = arith.constant 0 : index
    %c0_0 = arith.constant 0 : index
    %0 = vector.load %arg2[%c0, %c0_0] : memref<32x64xbf16, #tpu.memory_space<vmem>>, vector<32x64xbf16>
    %c0_1 = arith.constant 0 : index
    %c0_2 = arith.constant 0 : index
    %1 = vector.load %arg4[%c0_1, %c0_2] : memref<64x32xbf16, #tpu.memory_space<vmem>>, vector<64x32xbf16>
    %c0_3 = arith.constant 0 : index
    %c0_4 = arith.constant 0 : index
    %2 = vector.load %arg6[%c0_3, %c0_4] : memref<32x16xbf16, #tpu.memory_space<vmem>>, vector<32x16xbf16>
    %c0_5 = arith.constant 0 : index
    %c0_6 = arith.constant 0 : index
    %3 = vector.load %arg3[%c0_5, %c0_6] : memref<1x64xf32, #tpu.memory_space<vmem>>, vector<1x64xf32>
    %4 = vector.shape_cast %3 : vector<1x64xf32> to vector<1x64xf32>
    %5 = vector.broadcast %4 : vector<1x64xf32> to vector<8x64xf32>
    %c0_7 = arith.constant 0 : index
    %c0_8 = arith.constant 0 : index
    %6 = vector.load %arg5[%c0_7, %c0_8] : memref<1x32xf32, #tpu.memory_space<vmem>>, vector<1x32xf32>
    %7 = vector.shape_cast %6 : vector<1x32xf32> to vector<1x32xf32>
    %8 = vector.broadcast %7 : vector<1x32xf32> to vector<8x32xf32>
    %c0_9 = arith.constant 0 : index
    %c0_10 = arith.constant 0 : index
    %9 = vector.load %arg7[%c0_9, %c0_10] : memref<1x16xf32, #tpu.memory_space<vmem>>, vector<1x16xf32>
    %10 = vector.shape_cast %9 : vector<1x16xf32> to vector<1x16xf32>
    %11 = vector.broadcast %10 : vector<1x16xf32> to vector<8x16xf32>
    %c0_i32 = arith.constant 0 : i32
    %c8_i32 = arith.constant 8 : i32
    %12 = arith.muli %c0_i32, %c8_i32 : i32
    %13 = tpu.assume_multiple %12, 8 : i32
    %14 = arith.index_cast %13 : i32 to index
    %c0_11 = arith.constant 0 : index
    %15 = vector.load %arg1[%14, %c0_11] : memref<8x32xbf16, #tpu.memory_space<vmem>>, vector<8x32xbf16>
    %cst = arith.constant dense<0.000000e+00> : vector<8x64xf32>
    %16 = tpu.matmul %15, %0, %cst {dimension_numbers = #tpu.dot_dimension_numbers<[1], [0], [0], [1], [0, 0, 1, 1], [], []>} : vector<8x32xbf16>, vector<32x64xbf16>, vector<8x64xf32> -> vector<8x64xf32>
    %17 = arith.addf %16, %5 : vector<8x64xf32>
    %cst_12 = arith.constant 0.000000e+00 : f32
    %18 = vector.broadcast %cst_12 : f32 to vector<8x64xf32>
    %19 = arith.maximumf %17, %18 : vector<8x64xf32>
    %20 = arith.truncf %19 : vector<8x64xf32> to vector<8x64xbf16>
    %cst_13 = arith.constant dense<0.000000e+00> : vector<8x32xf32>
    %21 = tpu.matmul %20, %1, %cst_13 {dimension_numbers = #tpu.dot_dimension_numbers<[1], [0], [0], [1], [0, 0, 1, 1], [], []>} : vector<8x64xbf16>, vector<64x32xbf16>, vector<8x32xf32> -> vector<8x32xf32>
    %22 = arith.addf %21, %8 : vector<8x32xf32>
    %cst_14 = arith.constant 0.000000e+00 : f32
    %23 = vector.broadcast %cst_14 : f32 to vector<8x32xf32>
    %24 = arith.maximumf %22, %23 : vector<8x32xf32>
    %25 = arith.truncf %24 : vector<8x32xf32> to vector<8x32xbf16>
    %cst_15 = arith.constant dense<0.000000e+00> : vector<8x16xf32>
    %26 = tpu.matmul %25, %2, %cst_15 {dimension_numbers = #tpu.dot_dimension_numbers<[1], [0], [0], [1], [0, 0, 1, 1], [], []>} : vector<8x32xbf16>, vector<32x16xbf16>, vector<8x16xf32> -> vector<8x16xf32>
    %27 = arith.addf %26, %11 : vector<8x16xf32>
    %28 = arith.index_cast %13 : i32 to index
    %c0_16 = arith.constant 0 : index
    %29 = vector.load %arg8[%28, %c0_16] : memref<8x16xf32, #tpu.memory_space<vmem>>, vector<8x16xf32>
    tpu.vector_store %arg8[%28, %c0_16], %27 {strides = array<i32>} : memref<8x16xf32, #tpu.memory_space<vmem>>, vector<8x16xf32>,
    %c1_i32 = arith.constant 1 : i32
    return
  }
  func.func @transform_0(%arg0: i32) -> (i32, i32) {
    %c0_i32 = arith.constant 0 : i32
    %c0_i32_0 = arith.constant 0 : i32
    return %arg0, %c0_i32 : i32, i32
  }
  func.func @transform_1(%arg0: i32) -> (i32, i32) {
    %c0_i32 = arith.constant 0 : i32
    %c0_i32_0 = arith.constant 0 : i32
    %c0_i32_1 = arith.constant 0 : i32
    return %c0_i32, %c0_i32_0 : i32, i32
  }
  func.func @transform_2(%arg0: i32) -> (i32, i32) {
    %c0_i32 = arith.constant 0 : i32
    %c0_i32_0 = arith.constant 0 : i32
    %c0_i32_1 = arith.constant 0 : i32
    return %c0_i32, %c0_i32_0 : i32, i32
  }
  func.func @transform_3(%arg0: i32) -> (i32, i32) {
    %c0_i32 = arith.constant 0 : i32
    %c0_i32_0 = arith.constant 0 : i32
    %c0_i32_1 = arith.constant 0 : i32
    return %c0_i32, %c0_i32_0 : i32, i32
  }
  func.func @transform_4(%arg0: i32) -> (i32, i32) {
    %c0_i32 = arith.constant 0 : i32
    %c0_i32_0 = arith.constant 0 : i32
    %c0_i32_1 = arith.constant 0 : i32
    return %c0_i32, %c0_i32_0 : i32, i32
  }
  func.func @transform_5(%arg0: i32) -> (i32, i32) {
    %c0_i32 = arith.constant 0 : i32
    %c0_i32_0 = arith.constant 0 : i32
    %c0_i32_1 = arith.constant 0 : i32
    return %c0_i32, %c0_i32_0 : i32, i32
  }
  func.func @transform_6(%arg0: i32) -> (i32, i32) {
    %c0_i32 = arith.constant 0 : i32
    %c0_i32_0 = arith.constant 0 : i32
    %c0_i32_1 = arith.constant 0 : i32
    return %c0_i32, %c0_i32_0 : i32, i32
  }
  func.func @transform_7(%arg0: i32) -> (i32, i32) {
    %c0_i32 = arith.constant 0 : i32
    %c0_i32_0 = arith.constant 0 : i32
    return %arg0, %c0_i32 : i32, i32
  }
}

</mosaic_0001>

<bundles_post_ra>
// kernel: mlp_forward.1
= control target key start
LH: loop header
LB: loop body
LE: loop exit
PB: predicated region body
PF: predicated region fallthrough
CT: control target
= control target key end

     0   :  { %12 = vsyncpa [#allocation3], 0  ;;  %s777_s0 = inlined_call_operand.hbm [shape: bf16[8,32], index: 0, kind: input, shape index: {}]   ;;  %s778_s1 = inlined_call_operand.hbm [shape: bf16[32,64], index: 1, kind: input, shape index: {}]   ;;  %s779_s2 = inlined_call_operand.hbm [shape: f32[1,64], index: 2, kind: input, shape index: {}]   ;;  %s780_s3 = inlined_call_operand.hbm [shape: bf16[64,32], index: 3, kind: input, shape index: {}]   ;;  %s781_s4 = inlined_call_operand.hbm [shape: f32[1,32], index: 4, kind: input, shape index: {}]   ;;  %s782_s5 = inlined_call_operand.hbm [shape: bf16[32,16], index: 5, kind: input, shape index: {}]   ;;  %s783_s6 = inlined_call_operand.hbm [shape: f32[1,16], index: 6, kind: input, shape index: {}]   ;;  %s784_s7 = inlined_call_operand.hbm [shape: f32[8,16], index: 7, kind: output, shape index: {}]  }
   0x1   :  { %13 = vsyncpa [#allocation6], 0 }
   0x2   :  { %14 = vsyncpa [#allocation9], 0 }
   0x3   :  { %15 = vsyncpa [#allocation12], 0 }
   0x4   :  { %16 = vsyncpa [#allocation4], 0  ;;  %s615_s24 = smov [#allocation5]   ;;  %s429_s28 = scalar_lea.hbm %s778_s1, 256 }
   0x5   :  { %s32_s25 = sshll.u32 %s615_s24, 4  ;;  %p430_p0 = scmp.ne.s32.totalorder %s778_s1, %s429_s28  ;;  %s33_s25 = int_to_ptr.vmem [resolvable:$true] %s32_s25 }
   0x6   :  { %p433_p1 = scmp.lt.u32.totalorder %s429_s28, %s778_s1 }
   0x8   :  { %p435_p2 = pnand %p433_p1, %p430_p0 }
   0xa   :  { %438 = shalt.err (!%p435_p2)
}
   0xb   :  { %s439_s10 = scalar_lea.vmem %s33_s25, 256  ;;  %p444_p4 = scmp.lt.s32.totalorder %s33_s25, %s33_s25 }
   0xc   :  { %p440_p3 = scmp.ne.s32.totalorder %s33_s25, %s439_s10  ;;  %p445_p5 = scmp.lt.s32.totalorder %s439_s10, %s439_s10 }
   0xe   :  { %p446_p6 = por %p445_p5, %p444_p4 }
  0x10   :  { %p447_p7 = pnand %p446_p6, %p440_p3 }
  0x12   :  { %450 = shalt.err (!%p447_p7)
}
  0x13   :  { %s616_s11 = smov 64   ;;  %s617_s12 = smov 4  }
  0x14   :  { %38 = dma.hbm_to_vmem [thread:$0]  %s778_s1, 256, %s33_s25, [#allocation6], %s616_s11, %s616_s11, %s617_s12  }
  0x15   :  { %s618_s15 = smov [#allocation8]   ;;  %s619_s17 = smov [#allocation11]  }
  0x16   :  { %s54_s16 = sshll.u32 %s618_s15, 4  ;;  %s76_s18 = sshll.u32 %s619_s17, 4  ;;  %s55_s16 = int_to_ptr.vmem [resolvable:$true] %s54_s16  ;;  %s77_s18 = int_to_ptr.vmem [resolvable:$true] %s76_s18 }
  0x17   :  { %s451_s21 = scalar_lea.hbm %s780_s3, 512 }
  0x18   :  { %p452_p8 = scmp.ne.s32.totalorder %s780_s3, %s451_s21  ;;  %p455_p9 = scmp.lt.u32.totalorder %s451_s21, %s780_s3 }
  0x1a   :  { %p457_p10 = pnand %p455_p9, %p452_p8 }
  0x1c   :  { %460 = shalt.err (!%p457_p10)
}
  0x1d   :  { %s461_s1 = scalar_lea.vmem %s55_s16, 512  ;;  %p466_p12 = scmp.lt.s32.totalorder %s55_s16, %s55_s16 }
  0x1e   :  { %p462_p11 = scmp.ne.s32.totalorder %s55_s16, %s461_s1  ;;  %p467_p13 = scmp.lt.s32.totalorder %s461_s1, %s461_s1 }
  0x20   :  { %p468_p0 = por %p467_p13, %p466_p12 }
  0x22   :  { %p469_p1 = pnand %p468_p0, %p462_p11 }
  0x24   :  { %472 = shalt.err (!%p469_p1)
}
  0x25   :  { %60 = dma.hbm_to_vmem [thread:$0]  %s780_s3, 512, %s55_s16, [#allocation9], %s616_s11, %s616_s11, %s617_s12  }
  0x26   :  { %s473_s30 = scalar_lea.hbm %s782_s5, 256 }
  0x27   :  { %p474_p2 = scmp.ne.s32.totalorder %s782_s5, %s473_s30  ;;  %p477_p3 = scmp.lt.u32.totalorder %s473_s30, %s782_s5 }
  0x29   :  { %p479_p4 = pnand %p477_p3, %p474_p2 }
  0x2b   :  { %482 = shalt.err (!%p479_p4)
}
  0x2c   :  { %s483_s14 = scalar_lea.vmem %s77_s18, 256  ;;  %p488_p6 = scmp.lt.s32.totalorder %s77_s18, %s77_s18 }
  0x2d   :  { %p484_p5 = scmp.ne.s32.totalorder %s77_s18, %s483_s14  ;;  %p489_p7 = scmp.lt.s32.totalorder %s483_s14, %s483_s14 }
  0x2f   :  { %p490_p8 = por %p489_p7, %p488_p6 }
  0x31   :  { %p491_p9 = pnand %p490_p8, %p484_p5 }
  0x33   :  { %494 = shalt.err (!%p491_p9)
}
  0x34   :  { %82 = dma.hbm_to_vmem [thread:$0]  %s782_s5, 256, %s77_s18, [#allocation12], %s616_s11, %s616_s11, %s617_s12  }
  0x35   :  { %s620_s16 = smov [#allocation2]   ;;  %s621_s19 = smov [#allocation7]  }
  0x36   :  { %s23_s17 = sshll.u32 %s620_s16, 4  ;;  %s45_s20 = sshll.u32 %s621_s19, 4  ;;  %s24_s17 = int_to_ptr.vmem [resolvable:$true] %s23_s17  ;;  %s46_s20 = int_to_ptr.vmem [resolvable:$true] %s45_s20 }
  0x37   :  { %s495_s23 = scalar_lea.hbm %s777_s0, 64 }
  0x38   :  { %p496_p10 = scmp.ne.s32.totalorder %s777_s0, %s495_s23  ;;  %p499_p11 = scmp.lt.u32.totalorder %s495_s23, %s777_s0 }
  0x3a   :  { %p501_p12 = pnand %p499_p11, %p496_p10 }
  0x3c   :  { %504 = shalt.err (!%p501_p12)
}
  0x3d   :  { %s505_s5 = scalar_lea.vmem %s24_s17, 64  ;;  %p510_p0 = scmp.lt.s32.totalorder %s24_s17, %s24_s17 }
  0x3e   :  { %p506_p13 = scmp.ne.s32.totalorder %s24_s17, %s505_s5  ;;  %p511_p1 = scmp.lt.s32.totalorder %s505_s5, %s505_s5 }
  0x40   :  { %p512_p2 = por %p511_p1, %p510_p0 }
  0x42   :  { %p513_p3 = pnand %p512_p2, %p506_p13 }
  0x44   :  { %516 = shalt.err (!%p513_p3)
}
  0x45   :  { %26 = dma.hbm_to_vmem [thread:$0]  %s777_s0, 64, %s24_s17, [#allocation3]  }
  0x46   :  { %s517_s28 = scalar_lea.hbm %s779_s2, 16 }
  0x47   :  { %p518_p4 = scmp.ne.s32.totalorder %s779_s2, %s517_s28  ;;  %p521_p5 = scmp.lt.u32.totalorder %s517_s28, %s779_s2 }
  0x49   :  { %p523_p6 = pnand %p521_p5, %p518_p4 }
  0x4b   :  { %526 = shalt.err (!%p523_p6)
}
  0x4c   :  { %s527_s10 = scalar_lea.vmem %s46_s20, 16  ;;  %s531_s13 = scalar_lea.vmem %s46_s20, 32 }
  0x4d   :  { %p528_p7 = scmp.ne.s32.totalorder %s46_s20, %s527_s10  ;;  %p532_p8 = scmp.lt.s32.totalorder %s46_s20, %s46_s20 }
  0x4e   :  { %p533_p9 = scmp.lt.s32.totalorder %s531_s13, %s527_s10 }
  0x50   :  { %p534_p10 = por %p533_p9, %p532_p8 }
  0x52   :  { %p535_p11 = pnand %p534_p10, %p528_p7 }
  0x54   :  { %538 = shalt.err (!%p535_p11)
}
  0x55   :  { %48 = dma.hbm_to_vmem [thread:$0]  %s779_s2, 16, %s46_s20, [#allocation6]  }
  0x56   :  { %s622_s3 = smov [#allocation10]   ;;  %s623_s16 = smov [#allocation13]  }
  0x57   :  { %s67_s15 = sshll.u32 %s622_s3, 4  ;;  %s89_s17 = sshll.u32 %s623_s16, 4  ;;  %s68_s15 = int_to_ptr.vmem [resolvable:$true] %s67_s15  ;;  %s90_s17 = int_to_ptr.vmem [resolvable:$true] %s89_s17 }
  0x58   :  { %s539_s22 = scalar_lea.hbm %s781_s4, 16 }
  0x59   :  { %p540_p12 = scmp.ne.s32.totalorder %s781_s4, %s539_s22  ;;  %p543_p13 = scmp.lt.u32.totalorder %s539_s22, %s781_s4 }
  0x5b   :  { %p545_p0 = pnand %p543_p13, %p540_p12 }
  0x5d   :  { %548 = shalt.err (!%p545_p0)
}
  0x5e   :  { %s549_s2 = scalar_lea.vmem %s68_s15, 16  ;;  %s553_s20 = scalar_lea.vmem %s68_s15, 32 }
  0x5f   :  { %p550_p1 = scmp.ne.s32.totalorder %s68_s15, %s549_s2  ;;  %p554_p2 = scmp.lt.s32.totalorder %s68_s15, %s68_s15 }
  0x60   :  { %p555_p3 = scmp.lt.s32.totalorder %s553_s20, %s549_s2 }
  0x62   :  { %p556_p4 = por %p555_p3, %p554_p2 }
  0x64   :  { %p557_p5 = pnand %p556_p4, %p550_p1 }
  0x66   :  { %560 = shalt.err (!%p557_p5)
}
  0x67   :  { %70 = dma.hbm_to_vmem [thread:$0]  %s781_s4, 16, %s68_s15, [#allocation9]  }
  0x68   :  { %s561_s18 = scalar_lea.hbm %s783_s6, 16 }
  0x69   :  { %p562_p6 = scmp.ne.s32.totalorder %s783_s6, %s561_s18  ;;  %p565_p7 = scmp.lt.u32.totalorder %s561_s18, %s783_s6 }
  0x6b   :  { %p567_p8 = pnand %p565_p7, %p562_p6 }
  0x6d   :  { %570 = shalt.err (!%p567_p8)
}
  0x6e   :  { %s571_s8 = scalar_lea.vmem %s90_s17, 16  ;;  %s575_s9 = scalar_lea.vmem %s90_s17, 32 }
  0x6f   :  { %p572_p9 = scmp.ne.s32.totalorder %s90_s17, %s571_s8  ;;  %p576_p10 = scmp.lt.s32.totalorder %s90_s17, %s90_s17 }
  0x70   :  { %p577_p11 = scmp.lt.s32.totalorder %s575_s9, %s571_s8 }
  0x72   :  { %p578_p12 = por %p577_p11, %p576_p10 }
  0x74   :  { %p579_p13 = pnand %p578_p12, %p572_p9 }
  0x76   :  { %582 = shalt.err (!%p579_p13)
}
  0x77   :  { %92 = dma.hbm_to_vmem [thread:$0]  %s783_s6, 16, %s90_s17, [#allocation12]  }
  0x78   :  { %605 = dma.done.wait [#allocation3], 64  }
  0x79   :  { %606 = vsyncadd [#allocation3], 4294967232 }
  0x7a   :  { %607 = dma.done.wait [#allocation6], 272  }
  0x7b   :  { %608 = vsyncadd [#allocation6], 4294967024 }
  0x7c   :  { %609 = dma.done.wait [#allocation9], 528  }
  0x7d   :  { %610 = vsyncadd [#allocation9], 4294966768 }
  0x7e   :  { %611 = dma.done.wait [#allocation12], 272  }
  0x7f   :  { %612 = vsyncadd [#allocation12], 4294967024  ;;  %v624_v0 = vmov 0.0   ;;  %vm625_vm0 = vmmov 0   ;;  %v421_v1 = vld [vmem:[#allocation5] sm:$0xff]   ;;  %v422_v2 = vld [vmem:[#allocation5 + $0x8] sm:$0xff]  }
  0x80   :  { %381 = vmatprep.subr.bf16.mxu0 %v624_v0  ;;  %385 = vmatprep.mubr.msk.bf16.mxu0 %vm625_vm0, %v624_v0  ;;  %v423_v3 = vld [vmem:[#allocation8] sm:$0xff]   ;;  %v152_v4 = vld [vmem:[#allocation2] sm:$0xf]  ;;  %vm165_vm1 = vcmask 261120   ;;  %v425_v6 = vld [vmem:[#allocation8 + $0x10] sm:$0xff]   ;;  %vm235_vm2 = vcmask 523264  }
  0x81   :  { %389 = vmatprep.subr.bf16.mxu1 %v624_v0  ;;  %397 = vmatprep.mubr.msk.bf16.mxu1 %vm625_vm0, %v624_v0  ;;  %v424_v5 = vld [vmem:[#allocation8 + $0x8] sm:$0xff]   ;;  %v426_v7 = vld [vmem:[#allocation8 + $0x18] sm:$0xff]   ;;  %v357_v18 = vld [vmem:[#allocation10] ss:$0 sm:$0xff]  ;;  %s626_s6 = smov [#allocation14]   ;;  %vm336_vm3 = vcmask 130048  }
  0x82   :  { %382 = vmatpush3.bf16.msra.mxu0 %v421_v1  ;;  %390 = vmatpush3.bf16.msra.mxu1 %v423_v3  ;;  %v427_v8 = vld [vmem:[#allocation11] sm:$0xff]   ;;  %v356_v9 = vld [vmem:[#allocation7] ss:$0 sm:$0xff]  ;;  %v428_v17 = vld [vmem:[#allocation11 + $0x8] sm:$0xff]   ;;  %s344_s13 = sshll.u32 %s626_s6, 4  ;;  %s345_s13 = int_to_ptr.vmem [resolvable:$true] %s344_s13 }
  0x83   :  { %383 = vmatprep.subr.bf16.mxu0 %v624_v0  ;;  %391 = vmatprep.subr.bf16.mxu1 %v624_v0  ;;  %v358_v26 = vld [vmem:[#allocation13] ss:$0 sm:$0xff]  ;;  %s583_s0 = scalar_lea.vmem %s345_s13, 128  ;;  %p588_p1 = scmp.lt.s32.totalorder %s345_s13, %s345_s13 }
  0x84   :  { %p584_p0 = scmp.ne.s32.totalorder %s345_s13, %s583_s0  ;;  %p589_p2 = scmp.lt.s32.totalorder %s583_s0, %s583_s0 }
  0x86   :  { %384 = vmatpush3.bf16.msra.mxu0 %v422_v2  ;;  %392 = vmatpush3.bf16.msra.mxu1 %v424_v5  ;;  %p590_p3 = por %p589_p2, %p588_p1 }
  0x87   :  { %401 = vmatprep.subr.bf16.mxu0 %v624_v0  ;;  %393 = vmatprep.subr.bf16.mxu1 %v624_v0 }
  0x88   :  { %p591_p4 = pnand %p590_p3, %p584_p0 }
  0x89   :  { %386 = vmatmul.mubr.msk.bf16.vlgmr.msra.gmra.mrb[0].mxu0 %vm165_vm1, %v152_v4 }
  0x8a   :  { %405 = vmatprep.mubr.msk.bf16.mxu0 %vm625_vm0, %v624_v0  ;;  %394 = vmatpush3.bf16.msra.mxu1 %v425_v6 }
  0x8b   :  { %395 = vmatprep.subr.bf16.mxu1 %v624_v0  ;;  %402 = vmatpush3.bf16.msra.mxu0 %v427_v8 }
  0x8c   :  { %403 = vmatprep.subr.bf16.mxu0 %v624_v0 }
  0x8e   :  { %396 = vmatpush3.bf16.msra.mxu1 %v426_v7 }
  0x8f   :  { %404 = vmatpush3.bf16.msra.mxu0 %v428_v17 }
 0x15c   :  { %v203_v10 = vpop.f32.mrb[0].mxu0 }
 0x15d   :  { %v204_v11 = vadd.f32 %v356_v9, %v203_v10  ;;  %v387_v12 = vpop.f32.mrb[1].mxu0 }
 0x15e   :  { %v206_v13 = vpop.f32.mrb[2].mxu0 }
 0x15f   :  { %v209_v14 = vmax.f32 %v204_v11, 0.0  ;;  %v388_v15 = vpop.f32.mrb[3].mxu0 }
 0x161   :  { %v210_v16 = vpack.c.bf16 %v209_v14, %v209_v14 }
 0x163   :  { %398 = vmatmul.mubr.msk.bf16.vlgmr.msra.gmra.mrb[0].mxu1 %vm235_vm2, %v210_v16 }
 0x236   :  { %v273_v19 = vpop.f32.mrb[0].mxu1 }
 0x237   :  { %v274_v20 = vadd.f32 %v357_v18, %v273_v19  ;;  %v399_v21 = vpop.f32.mrb[1].mxu1 }
 0x238   :  { %v276_v22 = vpop.f32.mrb[2].mxu1 }
 0x239   :  { %v279_v23 = vmax.f32 %v274_v20, 0.0  ;;  %v400_v24 = vpop.f32.mrb[3].mxu1 }
 0x23b   :  { %v280_v25 = vpack.c.bf16 %v279_v23, %v279_v23 }
 0x23d   :  { %406 = vmatmul.mubr.msk.bf16.vlgmr.msra.gmra.mrb[4].mxu0 %vm165_vm1, %v280_v25 }
 0x310   :  { %v330_v27 = vpop.f32.mrb[4].mxu0 }
 0x311   :  { %v331_v28 = vadd.f32 %v358_v26, %v330_v27  ;;  %v407_v29 = vpop.f32.mrb[5].mxu0 }
 0x312   :  { %v333_v30 = vpop.f32.mrb[6].mxu0 }
 0x313   :  { %v408_v31 = vpop.f32.mrb[7].mxu0  ;;  %337 = vst.msk [vmem:[#allocation14] sm:$0xff] %vm336_vm3, %v331_v28 }
 0x314   :  { %594 = shalt.err (!%p591_p4)
}
 0x315   :  { %s595_s15 = scalar_lea.hbm %s784_s7, 128 }
 0x316   :  { %p596_p5 = scmp.ne.s32.totalorder %s784_s7, %s595_s15  ;;  %p599_p6 = scmp.lt.u32.totalorder %s595_s15, %s784_s7 }
 0x318   :  { %p601_p7 = pnand %p599_p6, %p596_p5 }
 0x31a   :  { %604 = shalt.err (!%p601_p7)
}
 0x31b   :  { %347 = dma.vmem_to_hbm [thread:$0]  %s345_s13, 128, %s784_s7, [#allocation4]  }
 0x31c   :  { %613 = dma.done.wait [#allocation4], 128  }
 0x31d   :  { %614 = vsyncadd [#allocation4], 4294967168 }
 0x31e   :  { %351 = vsyncpa [#allocation3], 1 }
 0x31f   :  { %352 = vsyncpa [#allocation6], 1 }
 0x320   :  { %353 = vsyncpa [#allocation9], 1 }
 0x321   :  { %354 = vsyncpa [#allocation12], 1 }
 0x322   :  { %355 = vsyncpa [#allocation4], 1 }

</bundles_post_ra>
